<compile_context>
chip_gen: v7x
topology: tpu7x:2x2x1
jax: 0.10.0
libtpu: 0.0.40
codegen_flags: <defaults>
</compile_context>

<pallas_src>
import functools

import jax
import jax.numpy as jnp
from jax import lax
from jax.experimental import pallas as pl
from jax.experimental.pallas import tpu as pltpu

_LANES = 128
_SUBLANES = 8
_TILE_TARGET_BYTES = 4 * 1024 * 1024      # per input buffer (padded footprint)
_VMEM_LIMIT = 32 * 1024 * 1024            # 2 x 4 MiB buffers + output, everywhere


def _round_up(x, m):
    return (x + m - 1) // m * m


# ---------------------------------------------------------------------------
# Fast path: lane-dense layout for N <= 128.
# ---------------------------------------------------------------------------
def _dense_kernel(mat_ref, out_ref, *, margin, group, total_elems, tile_rows,
                  steps):
    p = pl.program_id(0)                  # "parallel" partition (megacore)
    s = pl.program_id(1)                  # "arbitrary" reduction step
    t = p * steps + s                     # UNclamped linear tile index

    @pl.when(s == 0)
    def _init():
        out_ref[...] = jnp.zeros_like(out_ref)

    x = mat_ref[...]                      # (TR, 128) in the input dtype
    tr, lanes = x.shape

    # Broadcast each `group`-lane group's first element (the positive
    # distance) over the group: mask to group leaders, then log2(group)
    # exact XLU roll-adds (group divides 128, so groups never straddle rows).
    lane = lax.broadcasted_iota(jnp.int32, (tr, lanes), 1)
    pos = jnp.where((lane & (group - 1)) == 0, x, jnp.zeros_like(x))
    shift = 1
    while shift < group:
        pos = pos + pltpu.roll(pos, shift, axis=1)
        shift *= 2

    # Hinge in the native dtype (bf16 VALU on v6e/v7x); accumulate in f32.
    # Column 0 contributes max(0, margin) per row -> removed analytically in
    # the wrapper.  +inf column padding contributes exactly 0.
    hinge = jnp.maximum(pos - x + margin, 0.0).astype(jnp.float32)

    row0 = t * tile_rows

    @pl.when((row0 + tile_rows) * lanes <= total_elems)
    def _accumulate_full():               # mask-free common path
        out_ref[...] += hinge.reshape(tr // _SUBLANES, _SUBLANES, lanes).sum(0)

    @pl.when((row0 + tile_rows) * lanes > total_elems)
    def _accumulate_boundary():           # tail padding / clamped duplicate tile
        flat = (lax.broadcasted_iota(jnp.int32, (tr, lanes), 0) + row0) * lanes + lane
        h = jnp.where(flat < total_elems, hinge, 0.0)
        out_ref[...] += h.reshape(tr // _SUBLANES, _SUBLANES, lanes).sum(0)


def _dense_loss(dist, margin, tile_rows):
    B, N = dist.shape
    group = pl.next_power_of_2(N)         # divides 128 because N <= 128
    if group != N:
        # Pad rows with +inf: max(0, pos - inf + margin) == 0 exactly.
        dist = jnp.pad(dist, ((0, 0), (0, group - N)),
                       constant_values=float("inf"))
    total_elems = B * group

    flat = dist.reshape(-1)
    padded = _round_up(total_elems, _LANES)
    if padded // _LANES < _SUBLANES:
        padded = _SUBLANES * _LANES       # need at least 8 lane-rows
    if padded != total_elems:             # zero-padded tail is masked in-kernel
        flat = jnp.pad(flat, (0, padded - total_elems))
    rows = padded // _LANES
    mat = flat.reshape(rows, _LANES)      # free when B*N is already 128-aligned

    itemsize = dist.dtype.itemsize
    max_tr = (rows // _SUBLANES) * _SUBLANES
    tr = _TILE_TARGET_BYTES // (_LANES * itemsize) if tile_rows is None else tile_rows
    tr = min(max(_round_up(tr, _SUBLANES), _SUBLANES), max_tr)

    num_tiles = pl.cdiv(rows, tr)
    # Always split across two partitions when there is more than one tile;
    # the clamped index_map + in-kernel mask make odd tile counts safe.
    P = 2 if num_tiles >= 2 else 1
    S = pl.cdiv(num_tiles, P)

    kernel = functools.partial(
        _dense_kernel, margin=float(margin), group=group,
        total_elems=total_elems, tile_rows=tr, steps=S)

    partials = pl.pallas_call(
        kernel,
        out_shape=jax.ShapeDtypeStruct((P * _SUBLANES, _LANES), jnp.float32),
        grid=(P, S),
        in_specs=[pl.BlockSpec(
            (tr, _LANES),
            # Clamp so the duplicated tile of an odd split re-reads a valid
            # block; the kernel zeroes it via its unclamped index.
            lambda p, s: (jnp.minimum(p * S + s, num_tiles - 1), 0))],
        out_specs=pl.BlockSpec((_SUBLANES, _LANES), lambda p, s: (p, 0)),
        compiler_params=pltpu.CompilerParams(
            dimension_semantics=("parallel", "arbitrary"),
            vmem_limit_bytes=_VMEM_LIMIT),
    )(mat)

    correction = B * max(0.0, float(margin))   # positive column's constant hinge
    inv_count = 1.0 / float(B * (N - 1))
    return (jnp.sum(partials) - correction) * inv_count


# ---------------------------------------------------------------------------
# Fallback path: (tb, N) layout for N > 128 (lane waste <= ~2x there).
# ---------------------------------------------------------------------------
def _wide_kernel(dist_ref, out_ref, acc_ref, *, margin, total_rows, tile_rows,
                 steps):
    p = pl.program_id(0)
    s = pl.program_id(1)

    @pl.when(s == 0)
    def _init():
        acc_ref[...] = jnp.zeros_like(acc_ref)

    x = dist_ref[...]                     # (tb, N)
    tb, n = x.shape
    pos = x[:, 0:1]                       # lane-broadcast of column 0
    hinge = jnp.maximum(pos - x + margin, 0.0).astype(jnp.float32)

    # Mask padded rows beyond the batch (column 0 is removed analytically).
    row = lax.broadcasted_iota(jnp.int32, (tb, n), 0) + (p * steps + s) * tile_rows
    acc_ref[...] += jnp.where(row < total_rows, hinge, 0.0)

    @pl.when(s == steps - 1)
    def _finalize():
        out_ref[...] = jnp.broadcast_to(jnp.sum(acc_ref[...]), out_ref.shape)


def _pick_wide_tile_rows(B, N, itemsize):
    # Budget the PADDED footprint: double-buffered input + f32 accumulator.
    padded_cols = _round_up(N, _LANES)
    bytes_per_row = padded_cols * (2 * itemsize + 4)
    tb = max(_SUBLANES,
             ((2 * _TILE_TARGET_BYTES) // bytes_per_row // _SUBLANES) * _SUBLANES)
    return min(B, tb)


def _wide_loss(dist, margin, tile_rows):
    B, N = dist.shape
    itemsize = dist.dtype.itemsize
    if tile_rows is None:
        tb = _pick_wide_tile_rows(B, N, itemsize)
    else:
        tb = min(B, _round_up(tile_rows, _SUBLANES))

    num_tiles = pl.cdiv(B, tb)
    P = 2 if (num_tiles >= 2 and num_tiles % 2 == 0) else 1
    S = num_tiles // P

    kernel = functools.partial(_wide_kernel, margin=float(margin),
                               total_rows=B, tile_rows=tb, steps=S)

    partials = pl.pallas_call(
        kernel,
        out_shape=jax.ShapeDtypeStruct((P, _SUBLANES, _LANES), jnp.float32),
        grid=(P, S),
        in_specs=[pl.BlockSpec((tb, N), lambda p, s: (p * S + s, 0))],
        out_specs=pl.BlockSpec((1, _SUBLANES, _LANES), lambda p, s: (p, 0, 0)),
        scratch_shapes=[pltpu.VMEM((tb, N), jnp.float32)],
        compiler_params=pltpu.CompilerParams(
            dimension_semantics=("parallel", "arbitrary"),
            vmem_limit_bytes=_VMEM_LIMIT),
    )(dist)

    correction = B * max(0.0, float(margin))
    inv_count = 1.0 / float(B * (N - 1))
    return (jnp.sum(partials[:, 0, 0]) - correction) * inv_count


# ---------------------------------------------------------------------------
# Public wrapper + reference.
# ---------------------------------------------------------------------------
def max_margin_loss(dist, margin=1.0, tile_rows=None):
    """Pallas TPU forward for normCo MaxMarginLoss."""
    B, N = dist.shape
    if N < 2:
        raise ValueError("dist needs at least one negative column (N >= 2).")
    if N <= _LANES:
        return _dense_loss(dist, margin, tile_rows)
    return _wide_loss(dist, margin, tile_rows)


def _reference(dist, margin=1.0):
    """Pure-JAX reference matching the PyTorch module."""
    pos = dist[:, 0:1].astype(jnp.float32)
    neg = dist[:, 1:].astype(jnp.float32)
    return jnp.mean(jnp.maximum(pos - neg + margin, 0.0))


if __name__ == "__main__":
    keys = jax.random.split(jax.random.PRNGKey(0), 7)

    def check(dist, margin, tile_rows=None, atol=1e-4, rtol=1e-4):
        got = max_margin_loss(dist, margin=margin, tile_rows=tile_rows)
        jax.block_until_ready(got)
        want = _reference(dist, margin=margin)
        assert jnp.allclose(got, want, atol=atol, rtol=rtol), (dist.shape, got, want)

    # Small case from the module spec: 1 positive + 7 negative distances / row.
    check(jax.random.uniform(keys[0], (8, 8), jnp.float32, 0.0, 3.0), margin=1.0)

    # B*N not 128-aligned -> tail padding masked on the boundary tile.
    check(jax.random.uniform(keys[1], (20, 8), jnp.float32, 0.0, 3.0), margin=0.5)

    # Non-power-of-2 N -> +inf column padding path.
    check(jax.random.uniform(keys[2], (16, 6), jnp.float32, 0.0, 3.0), margin=0.75)

    # Odd tile count: P=2 via clamped index_map, duplicated tile fully masked,
    # boundary tile masked.
    check(jax.random.uniform(keys[3], (640, 8), jnp.float32, 0.0, 3.0),
          margin=1.0, tile_rows=16)

    # Even multi-tile split: mask-free fast branch on every tile.
    check(jax.random.uniform(keys[4], (1024, 8), jnp.float32, 0.0, 3.0),
          margin=1.0, tile_rows=16)

    # bf16 input: hinge computed natively in bf16, f32 accumulation.
    check(jax.random.uniform(keys[5], (64, 8), jnp.float32, 0.0, 3.0
                             ).astype(jnp.bfloat16),
          margin=1.0, atol=5e-2, rtol=5e-2)

    # Wide-N fallback path (N > 128), multi-tile with two partitions.
    check(jax.random.uniform(keys[6], (32, 160), jnp.float32, 0.0, 3.0),
          margin=1.0, tile_rows=8)

    print("KERNEL_OK")
</pallas_src>

<mosaic_0001>
module attributes {stable_mosaic.version = 11 : i64} {
  func.func @_dense_kernel(%arg0: i32, %arg1: i32, %arg2: memref<8x128xf32, #tpu.memory_space<vmem>>, %arg3: memref<8x128xf32, #tpu.memory_space<vmem>>) attributes {dimension_semantics = [#tpu.dimension_semantics<parallel>, #tpu.dimension_semantics<arbitrary>], iteration_bounds = array<i64: 1, 1>, scalar_prefetch = 0 : i64, scratch_operands = 0 : i64, tpu.core_type = #tpu.core_type<tc>, window_params = [{transform_indices = @transform_0, window_bounds = array<i64: 8, 128>}, {transform_indices = @transform_1, window_bounds = array<i64: 8, 128>}]} {
    %c1_i32 = arith.constant 1 : i32
    %0 = arith.muli %arg0, %c1_i32 : i32
    %1 = arith.addi %0, %arg1 : i32
    %c0_i32 = arith.constant 0 : i32
    %2 = arith.cmpi eq, %arg1, %c0_i32 : i32
    %3 = arith.extui %2 : i1 to i32
    %c0_i32_0 = arith.constant 0 : i32
    %4 = arith.cmpi ne, %3, %c0_i32_0 : i32
    scf.if %4 {
      %cst_12 = arith.constant 0.000000e+00 : f32
      %35 = vector.broadcast %cst_12 : f32 to vector<8x128xf32>
      %c0_13 = arith.constant 0 : index
      %c0_14 = arith.constant 0 : index
      %36 = vector.load %arg3[%c0_13, %c0_14] : memref<8x128xf32, #tpu.memory_space<vmem>>, vector<8x128xf32>
      tpu.vector_store %arg3[%c0_13, %c0_14], %35 {strides = array<i32>} : memref<8x128xf32, #tpu.memory_space<vmem>>, vector<8x128xf32>,
    } else {
    }
    %c0 = arith.constant 0 : index
    %c0_1 = arith.constant 0 : index
    %5 = vector.load %arg2[%c0, %c0_1] : memref<8x128xf32, #tpu.memory_space<vmem>>, vector<8x128xf32>
    %6 = tpu.iota {dimensions = array<i32: 1>} : vector<8x128xi32>
    %c7_i32 = arith.constant 7 : i32
    %7 = vector.broadcast %c7_i32 : i32 to vector<8x128xi32>
    %8 = arith.andi %6, %7 : vector<8x128xi32>
    %c0_i32_2 = arith.constant 0 : i32
    %9 = vector.broadcast %c0_i32_2 : i32 to vector<8x128xi32>
    %10 = arith.cmpi eq, %8, %9 : vector<8x128xi32>
    %cst = arith.constant 0.000000e+00 : f32
    %11 = vector.broadcast %cst : f32 to vector<8x128xf32>
    %12 = arith.select %10, %5, %11 : vector<8x128xi1>, vector<8x128xf32>
    %c1_i32_3 = arith.constant 1 : i32
    %13 = tpu.dynamic_rotate %12 by %c1_i32_3 dim 1 : vector<8x128xf32>, i32 -> vector<8x128xf32>
    %14 = arith.addf %12, %13 : vector<8x128xf32>
    %c2_i32 = arith.constant 2 : i32
    %15 = tpu.dynamic_rotate %14 by %c2_i32 dim 1 : vector<8x128xf32>, i32 -> vector<8x128xf32>
    %16 = arith.addf %14, %15 : vector<8x128xf32>
    %c4_i32 = arith.constant 4 : i32
    %17 = tpu.dynamic_rotate %16 by %c4_i32 dim 1 : vector<8x128xf32>, i32 -> vector<8x128xf32>
    %18 = arith.addf %16, %17 : vector<8x128xf32>
    %19 = arith.subf %18, %5 : vector<8x128xf32>
    %cst_4 = arith.constant 1.000000e+00 : f32
    %20 = vector.broadcast %cst_4 : f32 to vector<8x128xf32>
    %21 = arith.addf %19, %20 : vector<8x128xf32>
    %cst_5 = arith.constant 0.000000e+00 : f32
    %22 = vector.broadcast %cst_5 : f32 to vector<8x128xf32>
    %23 = arith.maximumf %21, %22 : vector<8x128xf32>
    %c8_i32 = arith.constant 8 : i32
    %24 = arith.muli %1, %c8_i32 : i32
    %c8_i32_6 = arith.constant 8 : i32
    %25 = arith.addi %24, %c8_i32_6 : i32
    %c128_i32 = arith.constant 128 : i32
    %26 = arith.muli %25, %c128_i32 : i32
    %c64_i32 = arith.constant 64 : i32
    %27 = arith.cmpi sle, %26, %c64_i32 : i32
    %28 = arith.extui %27 : i1 to i32
    %c0_i32_7 = arith.constant 0 : i32
    %29 = arith.cmpi ne, %28, %c0_i32_7 : i32
    scf.if %29 {
      %c0_12 = arith.constant 0 : index
      %c0_13 = arith.constant 0 : index
      %35 = vector.load %arg3[%c0_12, %c0_13] : memref<8x128xf32, #tpu.memory_space<vmem>>, vector<8x128xf32>
      %36 = vector.shape_cast %23 : vector<8x128xf32> to vector<1x8x128xf32>
      %cst_14 = arith.constant dense<0.000000e+00> : vector<8x128xf32>
      %37 = vector.multi_reduction <add>, %36, %cst_14 [0] : vector<1x8x128xf32> to vector<8x128xf32>
      %38 = arith.addf %35, %37 : vector<8x128xf32>
      %c0_15 = arith.constant 0 : index
      %c0_16 = arith.constant 0 : index
      %39 = vector.load %arg3[%c0_15, %c0_16] : memref<8x128xf32, #tpu.memory_space<vmem>>, vector<8x128xf32>
      tpu.vector_store %arg3[%c0_15, %c0_16], %38 {strides = array<i32>} : memref<8x128xf32, #tpu.memory_space<vmem>>, vector<8x128xf32>,
    } else {
    }
    %c8_i32_8 = arith.constant 8 : i32
    %30 = arith.addi %24, %c8_i32_8 : i32
    %c128_i32_9 = arith.constant 128 : i32
    %31 = arith.muli %30, %c128_i32_9 : i32
    %c64_i32_10 = arith.constant 64 : i32
    %32 = arith.cmpi sgt, %31, %c64_i32_10 : i32
    %33 = arith.extui %32 : i1 to i32
    %c0_i32_11 = arith.constant 0 : i32
    %34 = arith.cmpi ne, %33, %c0_i32_11 : i32
    scf.if %34 {
      %35 = tpu.iota {dimensions = array<i32: 0>} : vector<8x128xi32>
      %36 = vector.broadcast %24 : i32 to vector<8x128xi32>
      %37 = arith.addi %35, %36 : vector<8x128xi32>
      %c128_i32_12 = arith.constant 128 : i32
      %38 = vector.broadcast %c128_i32_12 : i32 to vector<8x128xi32>
      %39 = arith.muli %37, %38 : vector<8x128xi32>
      %40 = arith.addi %39, %6 : vector<8x128xi32>
      %c64_i32_13 = arith.constant 64 : i32
      %41 = vector.broadcast %c64_i32_13 : i32 to vector<8x128xi32>
      %42 = arith.cmpi slt, %40, %41 : vector<8x128xi32>
      %cst_14 = arith.constant 0.000000e+00 : f32
      %43 = vector.broadcast %cst_14 : f32 to vector<8x128xf32>
      %44 = arith.select %42, %23, %43 : vector<8x128xi1>, vector<8x128xf32>
      %c0_15 = arith.constant 0 : index
      %c0_16 = arith.constant 0 : index
      %45 = vector.load %arg3[%c0_15, %c0_16] : memref<8x128xf32, #tpu.memory_space<vmem>>, vector<8x128xf32>
      %46 = vector.shape_cast %44 : vector<8x128xf32> to vector<1x8x128xf32>
      %cst_17 = arith.constant dense<0.000000e+00> : vector<8x128xf32>
      %47 = vector.multi_reduction <add>, %46, %cst_17 [0] : vector<1x8x128xf32> to vector<8x128xf32>
      %48 = arith.addf %45, %47 : vector<8x128xf32>
      %c0_18 = arith.constant 0 : index
      %c0_19 = arith.constant 0 : index
      %49 = vector.load %arg3[%c0_18, %c0_19] : memref<8x128xf32, #tpu.memory_space<vmem>>, vector<8x128xf32>
      tpu.vector_store %arg3[%c0_18, %c0_19], %48 {strides = array<i32>} : memref<8x128xf32, #tpu.memory_space<vmem>>, vector<8x128xf32>,
    } else {
    }
    return
  }
  func.func @transform_0(%arg0: i32, %arg1: i32) -> (i32, i32) {
    %c1_i32 = arith.constant 1 : i32
    %0 = arith.muli %arg0, %c1_i32 : i32
    %1 = arith.addi %0, %arg1 : i32
    %c0_i32 = arith.constant 0 : i32
    %2 = arith.minsi %1, %c0_i32 : i32
    %c0_i32_0 = arith.constant 0 : i32
    %c0_i32_1 = arith.constant 0 : i32
    return %2, %c0_i32_0 : i32, i32
  }
  func.func @transform_1(%arg0: i32, %arg1: i32) -> (i32, i32) {
    %c0_i32 = arith.constant 0 : i32
    %c0_i32_0 = arith.constant 0 : i32
    return %arg0, %c0_i32 : i32, i32
  }
}

</mosaic_0001>

<bundles_post_ra>
// kernel: tpu_custom_call.1
= control target key start
LH: loop header
LB: loop body
LE: loop exit
PB: predicated region body
PF: predicated region fallthrough
CT: control target
= control target key end

     0   :  { %6 = vsyncpa [#allocation3], 0  ;;  %s190_s0 = inlined_call_operand.hbm [shape: f32[8,128], index: 0, kind: input, shape index: {}]   ;;  %s191_s1 = inlined_call_operand.hbm [shape: f32[8,128], index: 1, kind: output, shape index: {}]  }
   0x1   :  { %7 = vsyncpa [#allocation4], 0  ;;  %s151_s6 = smov [#allocation2]   ;;  %s103_s10 = scalar_lea.hbm %s190_s0, 128 }
   0x2   :  { %s19_s7 = sshll.u32 %s151_s6, 4  ;;  %p104_p0 = scmp.ne.s32.totalorder %s190_s0, %s103_s10  ;;  %s20_s7 = int_to_ptr.vmem [resolvable:$true] %s19_s7 }
   0x3   :  { %p107_p1 = scmp.lt.u32.totalorder %s103_s10, %s190_s0 }
   0x5   :  { %p109_p2 = pnand %p107_p1, %p104_p0 }
   0x7   :  { %112 = shalt.err (!%p109_p2)
}
   0x8   :  { %s113_s15 = scalar_lea.vmem %s20_s7, 128  ;;  %p118_p4 = scmp.lt.s32.totalorder %s20_s7, %s20_s7 }
   0x9   :  { %p114_p3 = scmp.ne.s32.totalorder %s20_s7, %s113_s15  ;;  %p119_p5 = scmp.lt.s32.totalorder %s113_s15, %s113_s15 }
   0xb   :  { %p120_p6 = por %p119_p5, %p118_p4 }
   0xd   :  { %p121_p7 = pnand %p120_p6, %p114_p3 }
   0xf   :  { %124 = shalt.err (!%p121_p7)
}
  0x10   :  { %22 = dma.hbm_to_vmem [thread:$0]  %s190_s0, 128, %s20_s7, [#allocation3]  }
  0x11   :  { %147 = dma.done.wait [#allocation3], 128  }
  0x12   :  { %148 = vsyncadd [#allocation3], 4294967168  ;;  %v36_v0 = vlaneseq  ;;  %v35_v6 = vld [vmem:[#allocation2] sm:$0xff]  ;;  %s152_s18 = smov 1   ;;  %s153_s19 = smov 2  }
  0x13   :  { %s154_s0 = smov 4   ;;  %s155_s20 = smov [#allocation5]  }
  0x14   :  { %v37_v1 = vand.u32 127, %v36_v0  ;;  %v69_v2 = vshrl.u32 %v36_v0, 7  ;;  %s86_s21 = sshll.u32 %s155_s20, 4  ;;  %s87_s21 = int_to_ptr.vmem [resolvable:$true] %s86_s21 }
  0x15   :  { %s125_s22 = scalar_lea.vmem %s87_s21, 128  ;;  %p130_p9 = scmp.lt.s32.totalorder %s87_s21, %s87_s21 }
  0x16   :  { %v38_v3 = vand.u32 7, %v37_v1  ;;  %v72_v4 = vmul.u32 128, %v69_v2  ;;  %p126_p8 = scmp.ne.s32.totalorder %s87_s21, %s125_s22  ;;  %p131_p10 = scmp.lt.s32.totalorder %s125_s22, %s125_s22 }
  0x18   :  { %vm39_vm0 = vcmp.eq.s32.totalorder %v38_v3, 0  ;;  %v73_v5 = vadd.s32 %v72_v4, %v37_v1  ;;  %p132_p11 = por %p131_p10, %p130_p9 }
  0x19   :  { %v40_v7 = vsel %vm39_vm0, %v35_v6, 0.0 }
  0x1a   :  { %41 = vrot.lane.b32.xlu0 %v40_v7, %s152_s18  ;;  %vm74_vm1 = vcmp.lt.s32.totalorder %v73_v5, 64  ;;  %p133_p12 = pnand %p132_p11, %p126_p8 }
  0x8c   :  { %v42_v8 = vpop.permute.xlu0 %41 }
  0x8d   :  { %v43_v9 = vadd.f32 %v42_v8, %v40_v7 }
  0x8f   :  { %44 = vrot.lane.b32.xlu0 %v43_v9, %s153_s19 }
 0x101   :  { %v45_v10 = vpop.permute.xlu0 %44 }
 0x102   :  { %v46_v11 = vadd.f32 %v45_v10, %v43_v9 }
 0x104   :  { %47 = vrot.lane.b32.xlu1 %v46_v11, %s154_s0 }
 0x176   :  { %v48_v12 = vpop.permute.xlu1 %47 }
 0x177   :  { %v49_v13 = vadd.f32 %v48_v12, %v46_v11 }
 0x179   :  { %v50_v14 = vsub.f32 %v49_v13, %v35_v6 }
 0x17b   :  { %v51_v15 = vadd.f32 1.0, %v50_v14 }
 0x17d   :  { %v52_v16 = vmax.f32 %v51_v15, 0.0 }
 0x17f   :  { %v75_v17 = vsel %vm74_vm1, %v52_v16, 0.0 }
 0x180   :  { %79 = vst [vmem:[#allocation5] sm:$0xff] %v75_v17 }
 0x181   :  { %136 = shalt.err (!%p133_p12)
}
 0x182   :  { %s137_s25 = scalar_lea.hbm %s191_s1, 128 }
 0x183   :  { %p138_p13 = scmp.ne.s32.totalorder %s191_s1, %s137_s25  ;;  %p141_p0 = scmp.lt.u32.totalorder %s137_s25, %s191_s1 }
 0x185   :  { %p143_p1 = pnand %p141_p0, %p138_p13 }
 0x187   :  { %146 = shalt.err (!%p143_p1)
}
 0x188   :  { %89 = dma.vmem_to_hbm [thread:$0]  %s87_s21, 128, %s191_s1, [#allocation4]  }
 0x189   :  { %149 = dma.done.wait [#allocation4], 128  }
 0x18a   :  { %150 = vsyncadd [#allocation4], 4294967168 }
 0x18b   :  { %93 = vsyncpa [#allocation3], 1 }
 0x18c   :  { %94 = vsyncpa [#allocation4], 1 }

</bundles_post_ra>
